<compile_context>
chip_gen: v7x
topology: tpu7x:2x2x1
jax: 0.10.0
libtpu: 0.0.40
codegen_flags: <defaults>
</compile_context>

<pallas_src>
import jax
import jax.numpy as jnp
from jax import lax
from jax.experimental import pallas as pl
from jax.experimental.pallas import tpu as pltpu

H_PAD = 128   # hidden size padded to the 128-wide lane axis
C_PAD = 128   # number of classes padded to the 128-wide lane axis


def build_learner(*, vocab, hidden, num_classes, seq_len, n_support, n_query,
                  num_tasks, inner_batch_size, inner_update_lr,
                  outer_update_lr, inner_update_step,
                  inner_update_step_eval=None, training=True):
    """Builds a jitted Learner.forward around one fused Pallas kernel."""
    assert n_support % inner_batch_size == 0
    # TODO(synk): if inner_batch_size < 8 (sublane granularity), fall back to a
    # masked full-support-set formulation instead of the aligned slice below.
    assert inner_batch_size % 8 == 0, "inner_batch_size must be 8-aligned"
    n_all = n_support + n_query
    n_batches = n_support // inner_batch_size
    n_steps = inner_update_step if training else (inner_update_step_eval or
                                                  inner_update_step)
    total_steps = n_steps * n_batches
    C = num_classes
    B = inner_batch_size
    lr = float(inner_update_lr)

    # ------------------------------------------------------------------ kernel
    def task_kernel(bow_ref,      # VMEM [1, n_all, V]      bag-of-words pooling weights
                    emb_ref,      # VMEM [V, H_PAD]         frozen embedding table
                    onehot_ref,   # VMEM [1, n_support, C_PAD]  support label one-hots
                    cmask_ref,    # VMEM [1, C_PAD]         additive 0 / -1e30 class mask
                    w_ref,        # VMEM [H_PAD, C_PAD]     meta W (resident)
                    b_ref,        # VMEM [1, C_PAD]         meta b (resident)
                    wf_out, bf_out, qlog_out):
        # (1) embedding gather + masked-mean pooling fused into ONE MXU matmul.
        #     Table & pooling weights stay f32 (one-time matmul, frozen params).
        pooled = jnp.dot(bow_ref[0], emb_ref[...],
                         preferred_element_type=jnp.float32)     # [n_all, H_PAD]
        pooled_bf = pooled.astype(jnp.bfloat16)                  # hoisted MXU cast
        cmask = cmask_ref[...]                                   # [1, C_PAD]
        onehot = onehot_ref[0]                                   # [ns, C_PAD]

        # fast model = deepcopy(meta model): fast params as live f32 values.
        wf = w_ref[...]
        bf = b_ref[...]

        # (2) inner SGD: fully-unrolled static loop (was a grid axis).
        # TODO(synk): reference uses RandomSampler; sequential mini-batches here.
        for s in range(total_steps):
            base = (s % n_batches) * B                 # static, sublane-aligned
            xb = pooled_bf[base:base + B, :]           # [B, H_PAD] bf16
            logits = jnp.dot(xb, wf.astype(jnp.bfloat16),
                             preferred_element_type=jnp.float32) + bf + cmask
            m = jnp.max(logits, axis=-1, keepdims=True)
            e = jnp.exp(logits - m)                    # reused for p AND grad
            p = e * pl.reciprocal(jnp.sum(e, axis=-1, keepdims=True),
                                  approx=True)         # EUP, off the VALU path
            g = (p - onehot[base:base + B, :]) * (1.0 / B)       # [B, C_PAD] f32
            # dW: contract the batch axis directly (lhs-transposed MXU matmul)
            dW = lax.dot_general(xb, g.astype(jnp.bfloat16),
                                 (((0,), (0,)), ((), ())),
                                 preferred_element_type=jnp.float32)
            db = jnp.sum(g, axis=0, keepdims=True)
            # inner_optimizer.step() (plain SGD) — f32 parameter math
            wf = wf - lr * dW
            bf = bf - lr * db

        # (3) forward-only query evaluation + export fast params for meta-grad
        pq = pooled_bf[n_support:, :]                  # [n_query, H_PAD] bf16
        qlog_out[0] = jnp.dot(pq, wf.astype(jnp.bfloat16),
                              preferred_element_type=jnp.float32) + bf
        wf_out[0] = wf
        bf_out[0] = bf

    grid_spec = pltpu.PrefetchScalarGridSpec(
        num_scalar_prefetch=0,
        grid=(num_tasks,),
        in_specs=[
            pl.BlockSpec((1, n_all, vocab), lambda t: (t, 0, 0)),      # bow
            pl.BlockSpec((vocab, H_PAD), lambda t: (0, 0)),            # emb table
            pl.BlockSpec((1, n_support, C_PAD), lambda t: (t, 0, 0)),  # label 1-hots
            pl.BlockSpec((1, C_PAD), lambda t: (0, 0)),                # class mask
            pl.BlockSpec((H_PAD, C_PAD), lambda t: (0, 0)),            # meta W
            pl.BlockSpec((1, C_PAD), lambda t: (0, 0)),                # meta b
        ],
        out_specs=(
            pl.BlockSpec((1, H_PAD, C_PAD), lambda t: (t, 0, 0)),      # fast W / task
            pl.BlockSpec((1, 1, C_PAD), lambda t: (t, 0, 0)),          # fast b / task
            pl.BlockSpec((1, n_query, C_PAD), lambda t: (t, 0, 0)),    # query logits
        ),
    )

    task_call = pl.pallas_call(
        task_kernel,
        out_shape=(
            jax.ShapeDtypeStruct((num_tasks, H_PAD, C_PAD), jnp.float32),
            jax.ShapeDtypeStruct((num_tasks, 1, C_PAD), jnp.float32),
            jax.ShapeDtypeStruct((num_tasks, n_query, C_PAD), jnp.float32),
        ),
        grid_spec=grid_spec,
        compiler_params=pltpu.CompilerParams(
            dimension_semantics=("parallel",),      # task axis -> both v7x TCs
            vmem_limit_bytes=32 * 1024 * 1024,      # safe on v5e/v6e/v7x
        ),
    )

    # ----------------------------------------------------------------- wrapper
    def learner_forward(meta_params, emb_pad, task_arrays):
        """meta_params=(W_pad,b_pad); task_arrays = stacked
        (s_ids, s_mask, s_labels, q_ids, q_mask, q_labels)."""
        w_pad, b_pad = meta_params
        s_ids, s_mask, s_labels, q_ids, q_mask, q_labels = task_arrays

        # Bag-of-words pooling weights: bow[t, n, v] = sum_s mask[t,n,s]/len * 1[ids==v]
        # Folds the embedding gather + masked mean pool into one in-kernel matmul.
        ids_all = jnp.concatenate([s_ids, q_ids], axis=1)             # [T,n_all,S]
        mask_all = jnp.concatenate([s_mask, q_mask], axis=1)          # [T,n_all,S]
        denom = jnp.maximum(jnp.sum(mask_all, axis=-1, keepdims=True), 1.0)
        mnorm = (mask_all / denom).astype(jnp.float32)
        tok_oh = jax.nn.one_hot(ids_all, vocab, dtype=jnp.float32)    # [T,n_all,S,V]
        bow = jnp.einsum('tns,tnsv->tnv', mnorm, tok_oh)              # [T,n_all,V]

        # step-invariant label one-hots and padded-class additive mask
        oh_sup = jax.nn.one_hot(s_labels, C_PAD, dtype=jnp.float32)   # [T,ns,C_PAD]
        cmask = jnp.where(jnp.arange(C_PAD) < C, 0.0, -1e30).astype(
            jnp.float32)[None, :]                                      # f32 only

        fast_w, fast_b, q_logits = task_call(bow, emb_pad, oh_sup, cmask,
                                             w_pad, b_pad)

        # query accuracy per task (only the real class lanes)
        preds = jnp.argmax(q_logits[:, :, :C], axis=-1).astype(q_labels.dtype)
        accs = jnp.mean((preds == q_labels).astype(jnp.float32), axis=-1)
        mean_acc = jnp.mean(accs)

        if training:
            # meta-grad = (meta - fast) averaged over tasks; outer SGD step
            gw = jnp.mean(w_pad[None] - fast_w, axis=0)
            gb = jnp.mean(b_pad[None] - fast_b, axis=0)
            new_meta = (w_pad - outer_update_lr * gw,
                        b_pad - outer_update_lr * gb)
        else:
            new_meta = (w_pad, b_pad)
        return mean_acc, new_meta

    return jax.jit(learner_forward)


# --------------------------------------------------------------------- driver
if __name__ == "__main__":
    V, H, C, S = 32, 32, 4, 8             # vocab, hidden, classes, seq len
    N_SUPPORT, N_QUERY = 16, 8
    NUM_TASKS = 2                          # multiple of 2 -> both v7x TCs busy
    INNER_BS = 8                           # sublane-aligned mini-batch
    INNER_LR, OUTER_LR = 0.1, 0.05
    INNER_STEPS = 2

    key = jax.random.PRNGKey(0)
    k_emb, k_w, k_tasks = jax.random.split(key, 3)

    embedding = jax.random.normal(k_emb, (V, H), jnp.float32) * 0.5
    W = jax.random.normal(k_w, (H, C), jnp.float32) * 0.1

    # pad frozen embedding / meta head once to lane-dense 128-wide tiles
    emb_pad = jnp.zeros((V, H_PAD), jnp.float32).at[:, :H].set(embedding)
    w_pad = jnp.zeros((H_PAD, C_PAD), jnp.float32).at[:H, :C].set(W)
    b_pad = jnp.zeros((1, C_PAD), jnp.float32)

    def make_split(k, n):
        k1, k2, k3 = jax.random.split(k, 3)
        ids = jax.random.randint(k1, (n, S), 0, V, dtype=jnp.int32)
        lens = jax.random.randint(k2, (n, 1), S // 2, S + 1, dtype=jnp.int32)
        mask = (jnp.arange(S)[None, :] < lens).astype(jnp.float32)
        labels = jax.random.randint(k3, (n,), 0, C, dtype=jnp.int32)
        return ids, mask, labels

    cols = [[] for _ in range(6)]
    for tk in jax.random.split(k_tasks, NUM_TASKS):
        ks, kq = jax.random.split(tk)
        si, sm, sl = make_split(ks, N_SUPPORT)
        qi, qm, ql = make_split(kq, N_QUERY)
        for c, v in zip(cols, (si, sm, sl, qi, qm, ql)):
            c.append(v)
    task_arrays = tuple(jnp.stack(c) for c in cols)

    learner = build_learner(
        vocab=V, hidden=H, num_classes=C, seq_len=S, n_support=N_SUPPORT,
        n_query=N_QUERY, num_tasks=NUM_TASKS, inner_batch_size=INNER_BS,
        inner_update_lr=INNER_LR, outer_update_lr=OUTER_LR,
        inner_update_step=INNER_STEPS, training=True)

    mean_acc, (new_w, new_b) = learner((w_pad, b_pad), emb_pad, task_arrays)
    jax.block_until_ready((mean_acc, new_w, new_b))

    # --------------------- pure-JAX reference (unpadded) sanity check --------
    def ref_forward(W0, b0):
        Wm, bm = W0, b0
        accs = []
        sgw = jnp.zeros_like(W0)
        sgb = jnp.zeros_like(b0)
        for t in range(NUM_TASKS):
            def pool(ids, mask):
                e = embedding[ids]
                d = jnp.maximum(mask.sum(-1, keepdims=True), 1.0)
                return (e * mask[..., None]).sum(1) / d
            ps = pool(task_arrays[0][t], task_arrays[1][t])
            sl = task_arrays[2][t]
            Wf, bf = Wm, bm
            for _ in range(INNER_STEPS):
                for bi in range(N_SUPPORT // INNER_BS):
                    xb = ps[bi * INNER_BS:(bi + 1) * INNER_BS]
                    yb = sl[bi * INNER_BS:(bi + 1) * INNER_BS]
                    p = jax.nn.softmax(xb @ Wf + bf, axis=-1)
                    oh = jax.nn.one_hot(yb, C, dtype=jnp.float32)
                    g = (p - oh) / INNER_BS
                    Wf = Wf - INNER_LR * (xb.T @ g)
                    bf = bf - INNER_LR * g.sum(0, keepdims=True)
            pq = pool(task_arrays[3][t], task_arrays[4][t])
            ql = task_arrays[5][t]
            accs.append(jnp.mean(
                (jnp.argmax(pq @ Wf + bf, -1) == ql).astype(jnp.float32)))
            sgw = sgw + (Wm - Wf)
            sgb = sgb + (bm - bf)
        Wm = Wm - OUTER_LR * sgw / NUM_TASKS
        bm = bm - OUTER_LR * sgb / NUM_TASKS
        return jnp.mean(jnp.stack(accs)), Wm, bm

    _, ref_W, ref_b = ref_forward(W, jnp.zeros((1, C), jnp.float32))
    assert bool(jnp.allclose(new_w[:H, :C], ref_W, rtol=2e-2, atol=2e-3)), \
        "meta W mismatch"
    assert bool(jnp.allclose(new_b[:, :C], ref_b, rtol=2e-2, atol=2e-3)), \
        "meta b mismatch"
    assert bool(jnp.isfinite(mean_acc))
    print("KERNEL_OK")
</pallas_src>

<mosaic_0001>
module attributes {stable_mosaic.version = 11 : i64} {
  func.func @task_kernel(%arg0: i32, %arg1: memref<1x24x32xf32, #tpu.memory_space<vmem>>, %arg2: memref<32x128xf32, #tpu.memory_space<vmem>>, %arg3: memref<1x16x128xf32, #tpu.memory_space<vmem>>, %arg4: memref<1x128xf32, #tpu.memory_space<vmem>>, %arg5: memref<128x128xf32, #tpu.memory_space<vmem>>, %arg6: memref<1x128xf32, #tpu.memory_space<vmem>>, %arg7: memref<1x128x128xf32, #tpu.memory_space<vmem>>, %arg8: memref<1x1x128xf32, #tpu.memory_space<vmem>>, %arg9: memref<1x8x128xf32, #tpu.memory_space<vmem>>) attributes {dimension_semantics = [#tpu.dimension_semantics<parallel>], iteration_bounds = array<i64: 2>, scalar_prefetch = 0 : i64, scratch_operands = 0 : i64, tpu.core_type = #tpu.core_type<tc>, window_params = [{transform_indices = @transform_0, window_bounds = array<i64: 1, 24, 32>}, {pipeline_mode = #tpu.pipeline_mode<synchronous>, transform_indices = @transform_1, window_bounds = array<i64: 32, 128>}, {transform_indices = @transform_2, window_bounds = array<i64: 1, 16, 128>}, {pipeline_mode = #tpu.pipeline_mode<synchronous>, transform_indices = @transform_3, window_bounds = array<i64: 1, 128>}, {pipeline_mode = #tpu.pipeline_mode<synchronous>, transform_indices = @transform_4, window_bounds = array<i64: 128, 128>}, {pipeline_mode = #tpu.pipeline_mode<synchronous>, transform_indices = @transform_5, window_bounds = array<i64: 1, 128>}, {transform_indices = @transform_6, window_bounds = array<i64: 1, 128, 128>}, {transform_indices = @transform_7, window_bounds = array<i64: 1, 1, 128>}, {transform_indices = @transform_8, window_bounds = array<i64: 1, 8, 128>}]} {
    %c0 = arith.constant 0 : index
    %c0_0 = arith.constant 0 : index
    %c0_1 = arith.constant 0 : index
    %0 = vector.load %arg1[%c0, %c0_0, %c0_1] : memref<1x24x32xf32, #tpu.memory_space<vmem>>, vector<1x24x32xf32>
    %1 = vector.shape_cast %0 : vector<1x24x32xf32> to vector<24x32xf32>
    %c0_2 = arith.constant 0 : index
    %c0_3 = arith.constant 0 : index
    %2 = vector.load %arg2[%c0_2, %c0_3] : memref<32x128xf32, #tpu.memory_space<vmem>>, vector<32x128xf32>
    %cst = arith.constant dense<0.000000e+00> : vector<24x128xf32>
    %3 = tpu.matmul %1, %2, %cst {dimension_numbers = #tpu.dot_dimension_numbers<[1], [0], [0], [1], [0, 0, 1, 1], [], []>} : vector<24x32xf32>, vector<32x128xf32>, vector<24x128xf32> -> vector<24x128xf32>
    %4 = arith.truncf %3 : vector<24x128xf32> to vector<24x128xbf16>
    %c0_4 = arith.constant 0 : index
    %c0_5 = arith.constant 0 : index
    %5 = vector.load %arg4[%c0_4, %c0_5] : memref<1x128xf32, #tpu.memory_space<vmem>>, vector<1x128xf32>
    %c0_6 = arith.constant 0 : index
    %c0_7 = arith.constant 0 : index
    %c0_8 = arith.constant 0 : index
    %6 = vector.load %arg3[%c0_6, %c0_7, %c0_8] : memref<1x16x128xf32, #tpu.memory_space<vmem>>, vector<1x16x128xf32>
    %7 = vector.shape_cast %6 : vector<1x16x128xf32> to vector<16x128xf32>
    %c0_9 = arith.constant 0 : index
    %c0_10 = arith.constant 0 : index
    %8 = vector.load %arg5[%c0_9, %c0_10] : memref<128x128xf32, #tpu.memory_space<vmem>>, vector<128x128xf32>
    %c0_11 = arith.constant 0 : index
    %c0_12 = arith.constant 0 : index
    %9 = vector.load %arg6[%c0_11, %c0_12] : memref<1x128xf32, #tpu.memory_space<vmem>>, vector<1x128xf32>
    %10 = vector.extract_strided_slice %4 {offsets = [0, 0], sizes = [8, 128], strides = [1, 1]} : vector<24x128xbf16> to vector<8x128xbf16>
    %11 = arith.truncf %8 : vector<128x128xf32> to vector<128x128xbf16>
    %cst_13 = arith.constant dense<0.000000e+00> : vector<8x128xf32>
    %12 = tpu.matmul %10, %11, %cst_13 {dimension_numbers = #tpu.dot_dimension_numbers<[1], [0], [0], [1], [0, 0, 1, 1], [], []>} : vector<8x128xbf16>, vector<128x128xbf16>, vector<8x128xf32> -> vector<8x128xf32>
    %13 = vector.broadcast %9 : vector<1x128xf32> to vector<8x128xf32>
    %14 = arith.addf %12, %13 : vector<8x128xf32>
    %15 = vector.broadcast %5 : vector<1x128xf32> to vector<8x128xf32>
    %16 = arith.addf %14, %15 : vector<8x128xf32>
    %cst_14 = arith.constant dense<0xFF800000> : vector<8xf32>
    %17 = vector.multi_reduction <maximumf>, %16, %cst_14 [1] : vector<8x128xf32> to vector<8xf32>
    %18 = vector.shape_cast %17 : vector<8xf32> to vector<8x1xf32>
    %19 = vector.broadcast %18 : vector<8x1xf32> to vector<8x128xf32>
    %20 = arith.subf %16, %19 : vector<8x128xf32>
    %21 = math.exp %20 : vector<8x128xf32>
    %cst_15 = arith.constant dense<0.000000e+00> : vector<8xf32>
    %22 = vector.multi_reduction <add>, %21, %cst_15 [1] : vector<8x128xf32> to vector<8xf32>
    %23 = vector.shape_cast %22 : vector<8xf32> to vector<8x1xf32>
    %24 = tpu.reciprocal %23 {approx = true} : vector<8x1xf32> -> vector<8x1xf32>
    %25 = vector.broadcast %24 : vector<8x1xf32> to vector<8x128xf32>
    %26 = arith.mulf %21, %25 : vector<8x128xf32>
    %27 = vector.extract_strided_slice %7 {offsets = [0, 0], sizes = [8, 128], strides = [1, 1]} : vector<16x128xf32> to vector<8x128xf32>
    %28 = arith.subf %26, %27 : vector<8x128xf32>
    %cst_16 = arith.constant 1.250000e-01 : f32
    %29 = vector.broadcast %cst_16 : f32 to vector<8x128xf32>
    %30 = arith.mulf %28, %29 : vector<8x128xf32>
    %31 = arith.truncf %30 : vector<8x128xf32> to vector<8x128xbf16>
    %cst_17 = arith.constant dense<0.000000e+00> : vector<128x128xf32>
    %32 = tpu.matmul %10, %31, %cst_17 {dimension_numbers = #tpu.dot_dimension_numbers<[0], [0], [1], [1], [0, 1, 1, 1], [], []>} : vector<8x128xbf16>, vector<8x128xbf16>, vector<128x128xf32> -> vector<128x128xf32>
    %cst_18 = arith.constant dense<0.000000e+00> : vector<128xf32>
    %33 = vector.multi_reduction <add>, %30, %cst_18 [0] : vector<8x128xf32> to vector<128xf32>
    %34 = vector.shape_cast %33 : vector<128xf32> to vector<1x128xf32>
    %cst_19 = arith.constant 1.000000e-01 : f32
    %35 = vector.broadcast %cst_19 : f32 to vector<128x128xf32>
    %36 = arith.mulf %35, %32 : vector<128x128xf32>
    %37 = arith.subf %8, %36 : vector<128x128xf32>
    %cst_20 = arith.constant 1.000000e-01 : f32
    %38 = vector.broadcast %cst_20 : f32 to vector<1x128xf32>
    %39 = arith.mulf %38, %34 : vector<1x128xf32>
    %40 = arith.subf %9, %39 : vector<1x128xf32>
    %41 = vector.extract_strided_slice %4 {offsets = [8, 0], sizes = [8, 128], strides = [1, 1]} : vector<24x128xbf16> to vector<8x128xbf16>
    %42 = arith.truncf %37 : vector<128x128xf32> to vector<128x128xbf16>
    %cst_21 = arith.constant dense<0.000000e+00> : vector<8x128xf32>
    %43 = tpu.matmul %41, %42, %cst_21 {dimension_numbers = #tpu.dot_dimension_numbers<[1], [0], [0], [1], [0, 0, 1, 1], [], []>} : vector<8x128xbf16>, vector<128x128xbf16>, vector<8x128xf32> -> vector<8x128xf32>
    %44 = vector.broadcast %40 : vector<1x128xf32> to vector<8x128xf32>
    %45 = arith.addf %43, %44 : vector<8x128xf32>
    %46 = vector.broadcast %5 : vector<1x128xf32> to vector<8x128xf32>
    %47 = arith.addf %45, %46 : vector<8x128xf32>
    %cst_22 = arith.constant dense<0xFF800000> : vector<8xf32>
    %48 = vector.multi_reduction <maximumf>, %47, %cst_22 [1] : vector<8x128xf32> to vector<8xf32>
    %49 = vector.shape_cast %48 : vector<8xf32> to vector<8x1xf32>
    %50 = vector.broadcast %49 : vector<8x1xf32> to vector<8x128xf32>
    %51 = arith.subf %47, %50 : vector<8x128xf32>
    %52 = math.exp %51 : vector<8x128xf32>
    %cst_23 = arith.constant dense<0.000000e+00> : vector<8xf32>
    %53 = vector.multi_reduction <add>, %52, %cst_23 [1] : vector<8x128xf32> to vector<8xf32>
    %54 = vector.shape_cast %53 : vector<8xf32> to vector<8x1xf32>
    %55 = tpu.reciprocal %54 {approx = true} : vector<8x1xf32> -> vector<8x1xf32>
    %56 = vector.broadcast %55 : vector<8x1xf32> to vector<8x128xf32>
    %57 = arith.mulf %52, %56 : vector<8x128xf32>
    %58 = vector.extract_strided_slice %7 {offsets = [8, 0], sizes = [8, 128], strides = [1, 1]} : vector<16x128xf32> to vector<8x128xf32>
    %59 = arith.subf %57, %58 : vector<8x128xf32>
    %cst_24 = arith.constant 1.250000e-01 : f32
    %60 = vector.broadcast %cst_24 : f32 to vector<8x128xf32>
    %61 = arith.mulf %59, %60 : vector<8x128xf32>
    %62 = arith.truncf %61 : vector<8x128xf32> to vector<8x128xbf16>
    %cst_25 = arith.constant dense<0.000000e+00> : vector<128x128xf32>
    %63 = tpu.matmul %41, %62, %cst_25 {dimension_numbers = #tpu.dot_dimension_numbers<[0], [0], [1], [1], [0, 1, 1, 1], [], []>} : vector<8x128xbf16>, vector<8x128xbf16>, vector<128x128xf32> -> vector<128x128xf32>
    %cst_26 = arith.constant dense<0.000000e+00> : vector<128xf32>
    %64 = vector.multi_reduction <add>, %61, %cst_26 [0] : vector<8x128xf32> to vector<128xf32>
    %65 = vector.shape_cast %64 : vector<128xf32> to vector<1x128xf32>
    %cst_27 = arith.constant 1.000000e-01 : f32
    %66 = vector.broadcast %cst_27 : f32 to vector<128x128xf32>
    %67 = arith.mulf %66, %63 : vector<128x128xf32>
    %68 = arith.subf %37, %67 : vector<128x128xf32>
    %cst_28 = arith.constant 1.000000e-01 : f32
    %69 = vector.broadcast %cst_28 : f32 to vector<1x128xf32>
    %70 = arith.mulf %69, %65 : vector<1x128xf32>
    %71 = arith.subf %40, %70 : vector<1x128xf32>
    %72 = vector.extract_strided_slice %4 {offsets = [0, 0], sizes = [8, 128], strides = [1, 1]} : vector<24x128xbf16> to vector<8x128xbf16>
    %73 = arith.truncf %68 : vector<128x128xf32> to vector<128x128xbf16>
    %cst_29 = arith.constant dense<0.000000e+00> : vector<8x128xf32>
    %74 = tpu.matmul %72, %73, %cst_29 {dimension_numbers = #tpu.dot_dimension_numbers<[1], [0], [0], [1], [0, 0, 1, 1], [], []>} : vector<8x128xbf16>, vector<128x128xbf16>, vector<8x128xf32> -> vector<8x128xf32>
    %75 = vector.broadcast %71 : vector<1x128xf32> to vector<8x128xf32>
    %76 = arith.addf %74, %75 : vector<8x128xf32>
    %77 = vector.broadcast %5 : vector<1x128xf32> to vector<8x128xf32>
    %78 = arith.addf %76, %77 : vector<8x128xf32>
    %cst_30 = arith.constant dense<0xFF800000> : vector<8xf32>
    %79 = vector.multi_reduction <maximumf>, %78, %cst_30 [1] : vector<8x128xf32> to vector<8xf32>
    %80 = vector.shape_cast %79 : vector<8xf32> to vector<8x1xf32>
    %81 = vector.broadcast %80 : vector<8x1xf32> to vector<8x128xf32>
    %82 = arith.subf %78, %81 : vector<8x128xf32>
    %83 = math.exp %82 : vector<8x128xf32>
    %cst_31 = arith.constant dense<0.000000e+00> : vector<8xf32>
    %84 = vector.multi_reduction <add>, %83, %cst_31 [1] : vector<8x128xf32> to vector<8xf32>
    %85 = vector.shape_cast %84 : vector<8xf32> to vector<8x1xf32>
    %86 = tpu.reciprocal %85 {approx = true} : vector<8x1xf32> -> vector<8x1xf32>
    %87 = vector.broadcast %86 : vector<8x1xf32> to vector<8x128xf32>
    %88 = arith.mulf %83, %87 : vector<8x128xf32>
    %89 = vector.extract_strided_slice %7 {offsets = [0, 0], sizes = [8, 128], strides = [1, 1]} : vector<16x128xf32> to vector<8x128xf32>
    %90 = arith.subf %88, %89 : vector<8x128xf32>
    %cst_32 = arith.constant 1.250000e-01 : f32
    %91 = vector.broadcast %cst_32 : f32 to vector<8x128xf32>
    %92 = arith.mulf %90, %91 : vector<8x128xf32>
    %93 = arith.truncf %92 : vector<8x128xf32> to vector<8x128xbf16>
    %cst_33 = arith.constant dense<0.000000e+00> : vector<128x128xf32>
    %94 = tpu.matmul %72, %93, %cst_33 {dimension_numbers = #tpu.dot_dimension_numbers<[0], [0], [1], [1], [0, 1, 1, 1], [], []>} : vector<8x128xbf16>, vector<8x128xbf16>, vector<128x128xf32> -> vector<128x128xf32>
    %cst_34 = arith.constant dense<0.000000e+00> : vector<128xf32>
    %95 = vector.multi_reduction <add>, %92, %cst_34 [0] : vector<8x128xf32> to vector<128xf32>
    %96 = vector.shape_cast %95 : vector<128xf32> to vector<1x128xf32>
    %cst_35 = arith.constant 1.000000e-01 : f32
    %97 = vector.broadcast %cst_35 : f32 to vector<128x128xf32>
    %98 = arith.mulf %97, %94 : vector<128x128xf32>
    %99 = arith.subf %68, %98 : vector<128x128xf32>
    %cst_36 = arith.constant 1.000000e-01 : f32
    %100 = vector.broadcast %cst_36 : f32 to vector<1x128xf32>
    %101 = arith.mulf %100, %96 : vector<1x128xf32>
    %102 = arith.subf %71, %101 : vector<1x128xf32>
    %103 = vector.extract_strided_slice %4 {offsets = [8, 0], sizes = [8, 128], strides = [1, 1]} : vector<24x128xbf16> to vector<8x128xbf16>
    %104 = arith.truncf %99 : vector<128x128xf32> to vector<128x128xbf16>
    %cst_37 = arith.constant dense<0.000000e+00> : vector<8x128xf32>
    %105 = tpu.matmul %103, %104, %cst_37 {dimension_numbers = #tpu.dot_dimension_numbers<[1], [0], [0], [1], [0, 0, 1, 1], [], []>} : vector<8x128xbf16>, vector<128x128xbf16>, vector<8x128xf32> -> vector<8x128xf32>
    %106 = vector.broadcast %102 : vector<1x128xf32> to vector<8x128xf32>
    %107 = arith.addf %105, %106 : vector<8x128xf32>
    %108 = vector.broadcast %5 : vector<1x128xf32> to vector<8x128xf32>
    %109 = arith.addf %107, %108 : vector<8x128xf32>
    %cst_38 = arith.constant dense<0xFF800000> : vector<8xf32>
    %110 = vector.multi_reduction <maximumf>, %109, %cst_38 [1] : vector<8x128xf32> to vector<8xf32>
    %111 = vector.shape_cast %110 : vector<8xf32> to vector<8x1xf32>
    %112 = vector.broadcast %111 : vector<8x1xf32> to vector<8x128xf32>
    %113 = arith.subf %109, %112 : vector<8x128xf32>
    %114 = math.exp %113 : vector<8x128xf32>
    %cst_39 = arith.constant dense<0.000000e+00> : vector<8xf32>
    %115 = vector.multi_reduction <add>, %114, %cst_39 [1] : vector<8x128xf32> to vector<8xf32>
    %116 = vector.shape_cast %115 : vector<8xf32> to vector<8x1xf32>
    %117 = tpu.reciprocal %116 {approx = true} : vector<8x1xf32> -> vector<8x1xf32>
    %118 = vector.broadcast %117 : vector<8x1xf32> to vector<8x128xf32>
    %119 = arith.mulf %114, %118 : vector<8x128xf32>
    %120 = vector.extract_strided_slice %7 {offsets = [8, 0], sizes = [8, 128], strides = [1, 1]} : vector<16x128xf32> to vector<8x128xf32>
    %121 = arith.subf %119, %120 : vector<8x128xf32>
    %cst_40 = arith.constant 1.250000e-01 : f32
    %122 = vector.broadcast %cst_40 : f32 to vector<8x128xf32>
    %123 = arith.mulf %121, %122 : vector<8x128xf32>
    %124 = arith.truncf %123 : vector<8x128xf32> to vector<8x128xbf16>
    %cst_41 = arith.constant dense<0.000000e+00> : vector<128x128xf32>
    %125 = tpu.matmul %103, %124, %cst_41 {dimension_numbers = #tpu.dot_dimension_numbers<[0], [0], [1], [1], [0, 1, 1, 1], [], []>} : vector<8x128xbf16>, vector<8x128xbf16>, vector<128x128xf32> -> vector<128x128xf32>
    %cst_42 = arith.constant dense<0.000000e+00> : vector<128xf32>
    %126 = vector.multi_reduction <add>, %123, %cst_42 [0] : vector<8x128xf32> to vector<128xf32>
    %127 = vector.shape_cast %126 : vector<128xf32> to vector<1x128xf32>
    %cst_43 = arith.constant 1.000000e-01 : f32
    %128 = vector.broadcast %cst_43 : f32 to vector<128x128xf32>
    %129 = arith.mulf %128, %125 : vector<128x128xf32>
    %130 = arith.subf %99, %129 : vector<128x128xf32>
    %cst_44 = arith.constant 1.000000e-01 : f32
    %131 = vector.broadcast %cst_44 : f32 to vector<1x128xf32>
    %132 = arith.mulf %131, %127 : vector<1x128xf32>
    %133 = arith.subf %102, %132 : vector<1x128xf32>
    %134 = vector.extract_strided_slice %4 {offsets = [16, 0], sizes = [8, 128], strides = [1, 1]} : vector<24x128xbf16> to vector<8x128xbf16>
    %135 = arith.truncf %130 : vector<128x128xf32> to vector<128x128xbf16>
    %cst_45 = arith.constant dense<0.000000e+00> : vector<8x128xf32>
    %136 = tpu.matmul %134, %135, %cst_45 {dimension_numbers = #tpu.dot_dimension_numbers<[1], [0], [0], [1], [0, 0, 1, 1], [], []>} : vector<8x128xbf16>, vector<128x128xbf16>, vector<8x128xf32> -> vector<8x128xf32>
    %137 = vector.broadcast %133 : vector<1x128xf32> to vector<8x128xf32>
    %138 = arith.addf %136, %137 : vector<8x128xf32>
    %c0_46 = arith.constant 0 : index
    %c0_47 = arith.constant 0 : index
    %c0_48 = arith.constant 0 : index
    %139 = vector.load %arg9[%c0_46, %c0_47, %c0_48] : memref<1x8x128xf32, #tpu.memory_space<vmem>>, vector<1x8x128xf32>
    %140 = vector.shape_cast %139 : vector<1x8x128xf32> to vector<8x128xf32>
    %141 = vector.shape_cast %138 : vector<8x128xf32> to vector<1x8x128xf32>
    tpu.vector_store %arg9[%c0_46, %c0_47, %c0_48], %141 {strides = array<i32>} : memref<1x8x128xf32, #tpu.memory_space<vmem>>, vector<1x8x128xf32>,
    %c0_49 = arith.constant 0 : index
    %c0_50 = arith.constant 0 : index
    %c0_51 = arith.constant 0 : index
    %142 = vector.load %arg7[%c0_49, %c0_50, %c0_51] : memref<1x128x128xf32, #tpu.memory_space<vmem>>, vector<1x128x128xf32>
    %143 = vector.shape_cast %142 : vector<1x128x128xf32> to vector<128x128xf32>
    %144 = vector.shape_cast %130 : vector<128x128xf32> to vector<1x128x128xf32>
    tpu.vector_store %arg7[%c0_49, %c0_50, %c0_51], %144 {strides = array<i32>} : memref<1x128x128xf32, #tpu.memory_space<vmem>>, vector<1x128x128xf32>,
    %c0_52 = arith.constant 0 : index
    %c0_53 = arith.constant 0 : index
    %c0_54 = arith.constant 0 : index
    %145 = vector.load %arg8[%c0_52, %c0_53, %c0_54] : memref<1x1x128xf32, #tpu.memory_space<vmem>>, vector<1x1x128xf32>
    %146 = vector.shape_cast %145 : vector<1x1x128xf32> to vector<1x128xf32>
    %147 = vector.shape_cast %133 : vector<1x128xf32> to vector<1x1x128xf32>
    tpu.vector_store %arg8[%c0_52, %c0_53, %c0_54], %147 {strides = array<i32>} : memref<1x1x128xf32, #tpu.memory_space<vmem>>, vector<1x1x128xf32>,
    return
  }
  func.func @transform_0(%arg0: i32) -> (i32, i32, i32) {
    %c0_i32 = arith.constant 0 : i32
    %c0_i32_0 = arith.constant 0 : i32
    %c0_i32_1 = arith.constant 0 : i32
    return %arg0, %c0_i32, %c0_i32_0 : i32, i32, i32
  }
  func.func @transform_1(%arg0: i32) -> (i32, i32) {
    %c0_i32 = arith.constant 0 : i32
    %c0_i32_0 = arith.constant 0 : i32
    %c0_i32_1 = arith.constant 0 : i32
    return %c0_i32, %c0_i32_0 : i32, i32
  }
  func.func @transform_2(%arg0: i32) -> (i32, i32, i32) {
    %c0_i32 = arith.constant 0 : i32
    %c0_i32_0 = arith.constant 0 : i32
    %c0_i32_1 = arith.constant 0 : i32
    return %arg0, %c0_i32, %c0_i32_0 : i32, i32, i32
  }
  func.func @transform_3(%arg0: i32) -> (i32, i32) {
    %c0_i32 = arith.constant 0 : i32
    %c0_i32_0 = arith.constant 0 : i32
    %c0_i32_1 = arith.constant 0 : i32
    return %c0_i32, %c0_i32_0 : i32, i32
  }
  func.func @transform_4(%arg0: i32) -> (i32, i32) {
    %c0_i32 = arith.constant 0 : i32
    %c0_i32_0 = arith.constant 0 : i32
    %c0_i32_1 = arith.constant 0 : i32
    return %c0_i32, %c0_i32_0 : i32, i32
  }
  func.func @transform_5(%arg0: i32) -> (i32, i32) {
    %c0_i32 = arith.constant 0 : i32
    %c0_i32_0 = arith.constant 0 : i32
    %c0_i32_1 = arith.constant 0 : i32
    return %c0_i32, %c0_i32_0 : i32, i32
  }
  func.func @transform_6(%arg0: i32) -> (i32, i32, i32) {
    %c0_i32 = arith.constant 0 : i32
    %c0_i32_0 = arith.constant 0 : i32
    %c0_i32_1 = arith.constant 0 : i32
    return %arg0, %c0_i32, %c0_i32_0 : i32, i32, i32
  }
  func.func @transform_7(%arg0: i32) -> (i32, i32, i32) {
    %c0_i32 = arith.constant 0 : i32
    %c0_i32_0 = arith.constant 0 : i32
    %c0_i32_1 = arith.constant 0 : i32
    return %arg0, %c0_i32, %c0_i32_0 : i32, i32, i32
  }
  func.func @transform_8(%arg0: i32) -> (i32, i32, i32) {
    %c0_i32 = arith.constant 0 : i32
    %c0_i32_0 = arith.constant 0 : i32
    %c0_i32_1 = arith.constant 0 : i32
    return %arg0, %c0_i32, %c0_i32_0 : i32, i32, i32
  }
}

</mosaic_0001>

<bundles_post_ra>
// kernel: learner_forward.1
= control target key start
LH: loop header
LB: loop body
LE: loop exit
PB: predicated region body
PF: predicated region fallthrough
CT: control target
= control target key end

     0   :  { %s2002_s27 = smov 0   ;;  %s2617_s0 = inlined_call_operand.vmem [shape: f32[2,24,32], index: 0, kind: input, shape index: {}]   ;;  %s2618_s1 = inlined_call_operand.vmem [shape: f32[32,128], index: 1, kind: input, shape index: {}]   ;;  %s2619_s2 = inlined_call_operand.vmem [shape: f32[2,16,128], index: 2, kind: input, shape index: {}]   ;;  %s2620_s3 = inlined_call_operand.vmem [shape: f32[1,128], index: 3, kind: input, shape index: {}]   ;;  %s2621_s4 = inlined_call_operand.vmem [shape: f32[128,128], index: 4, kind: input, shape index: {}]   ;;  %s2622_s5 = inlined_call_operand.vmem [shape: f32[1,128], index: 5, kind: input, shape index: {}]   ;;  %s2623_s6 = inlined_call_operand.vmem [shape: f32[2,128,128], index: 6, kind: output, shape index: {0}]   ;;  %s2624_s7 = inlined_call_operand.vmem [shape: f32[2,1,128], index: 7, kind: output, shape index: {1}]   ;;  %s2625_s8 = inlined_call_operand.vmem [shape: f32[2,8,128], index: 8, kind: output, shape index: {2}]  }
   0x1 LB: > { %s1579_s28 = sadd.s32 4294967295, %s1952_s27   ;;  %p1583_p0 = scmp.ge.s32.totalorder %s1952_s27, 1  ;;  %s1952_s27 = sphi %s2002_s27, %s19_s27  }
   0x2   : > { %p277_p1 = scmp.lt.s32.totalorder %s1952_s27, 3 }
   0x4   : > { %p278_p2 = pnand %p1583_p0, %p277_p1 }
   0x5   : > { %v349_v0 = vld [vmem:[%s2618_s1] sm:$0xff] (!%p278_p2)  ;;  %v350_v1 = vld [vmem:[%s2618_s1 + $0x8] sm:$0xff] (!%p278_p2)  ;;  %v351_v2 = vld [vmem:[%s2618_s1 + $0x10] sm:$0xff] (!%p278_p2)  ;;  %v1954_v3 = vmov (!%p278_p2), 0.0|0.0   ;;  %vm1955_vm0 = vmmov (!%p278_p2), 0   ;;  %v1956_v6 = vmov (!%p278_p2), 0.0   ;;  %v474_v39 = vlaneseq (!%p278_p2) }
   0x6   : > { %281 = sbr.rel (%p278_p2) target bundleno = 3611 (0xe1b), region = 44  ;;  %1907 = vmatprep.subr.bf16.mxu0 (!%p278_p2), %v1954_v3  ;;  %v1908_v4 = vpack.c.bf16 (!%p278_p2), %v350_v1, %v349_v0  ;;  %v352_v5 = vld [vmem:[%s2618_s1 + $0x18] sm:$0xff] (!%p278_p2)  ;;  %1726 = vmatprep.mubr.msk.f32.mxu0 (!%p278_p2), %vm1955_vm0, %v1956_v6  ;;  %p323_p3 = scmp.lt.s32.totalorder (!%p278_p2), %s1579_s28, 1  ;;  %v2027_v7 = vld [vmem:[%s2621_s4] sm:$0xff] (!%p278_p2)  ;;  %v2032_v8 = vld [vmem:[%s2621_s4 + $0x8] sm:$0xff] (!%p278_p2)  ;;  %vm353_vm1 = vcmask (!%p278_p2), 261120  }
   0x7   : > { %1735 = vmatprep.subr.bf16.mxu1 (!%p278_p2), %v1956_v6  ;;  %v465_v9 = vpack.c.bf16 (!%p278_p2), %v2032_v8, %v2027_v7  ;;  %v2040_v10 = vld [vmem:[%s2621_s4 + $0x10] sm:$0xff] (!%p278_p2)  ;;  %v2045_v11 = vld [vmem:[%s2621_s4 + $0x18] sm:$0xff] (!%p278_p2)  ;;  %1751 = vmatprep.mubr.msk.bf16.mxu1 (!%p278_p2), %vm1955_vm0, %v1956_v6  ;;  %v1911_v12 = vpack.c.bf16 (!%p278_p2), %v352_v5, %v351_v2  ;;  %v2058_v14 = vld [vmem:[%s2621_s4 + $0x20] sm:$0xff] (!%p278_p2)  ;;  %v475_v40 = vshrl.u32 (!%p278_p2), %v474_v39, 7  ;;  %vm554_vm2 = vcmask (!%p278_p2), 64512  }
   0x8   : > { %1909 = vmatpush3.bf16.msra.mxu0 (!%p278_p2), %v1908_v4  ;;  %v466_v13 = vpack.c.bf16 (!%p278_p2), %v2045_v11, %v2040_v10  ;;  %v2063_v15 = vld [vmem:[%s2621_s4 + $0x28] sm:$0xff] (!%p278_p2)  ;;  %v2077_v18 = vld [vmem:[%s2621_s4 + $0x30] sm:$0xff] (!%p278_p2)  ;;  %v2082_v19 = vld [vmem:[%s2621_s4 + $0x38] sm:$0xff] (!%p278_p2)  ;;  %vm579_vm3 = vcmask (!%p278_p2), 1043456  }
   0x9   : > { %1910 = vmatprep.subr.bf16.mxu0 (!%p278_p2), %v1954_v3  ;;  %1736 = vmatpush3.bf16.msra.mxu1 (!%p278_p2), %v465_v9  ;;  %v467_v17 = vpack.c.bf16 (!%p278_p2), %v2063_v15, %v2058_v14  ;;  %v468_v21 = vpack.c.bf16 (!%p278_p2), %v2082_v19, %v2077_v18  ;;  %v2094_v22 = vld [vmem:[%s2621_s4 + $0x40] sm:$0xff] (!%p278_p2)  ;;  %v2099_v23 = vld [vmem:[%s2621_s4 + $0x48] sm:$0xff] (!%p278_p2)  ;;  %v2110_v25 = vld [vmem:[%s2621_s4 + $0x50] sm:$0xff] (!%p278_p2)  ;;  %v2150_v41 = vsub.s32 (!%p278_p2), 0, %v475_v40 }
   0xa   : > { %1737 = vmatprep.subr.bf16.mxu1 (!%p278_p2), %v1956_v6  ;;  %v469_v24 = vpack.c.bf16 (!%p278_p2), %v2099_v23, %v2094_v22  ;;  %v2115_v26 = vld [vmem:[%s2621_s4 + $0x58] sm:$0xff] (!%p278_p2)  ;;  %v2124_v28 = vld [vmem:[%s2621_s4 + $0x60] sm:$0xff] (!%p278_p2)  ;;  %v2129_v29 = vld [vmem:[%s2621_s4 + $0x68] sm:$0xff] (!%p278_p2) }
   0xb   : > { %v470_v27 = vpack.c.bf16 (!%p278_p2), %v2115_v26, %v2110_v25  ;;  %v471_v30 = vpack.c.bf16 (!%p278_p2), %v2129_v29, %v2124_v28  ;;  %v2137_v31 = vld [vmem:[%s2621_s4 + $0x70] sm:$0xff] (!%p278_p2)  ;;  %v2142_v32 = vld [vmem:[%s2621_s4 + $0x78] sm:$0xff] (!%p278_p2)  ;;  %v2155_v42 = vld [vmem:[%s2622_s5] sm:$0x1] (!%p278_p2) }
   0xc   : > { %1912 = vmatpush3.bf16.msra.mxu0 (!%p278_p2), %v1911_v12  ;;  %v472_v33 = vpack.c.bf16 (!%p278_p2), %v2142_v32, %v2137_v31  ;;  %v477_v43 = vrot.slane (!%p278_p2), %v2155_v42, %v2150_v41  ;;  %v2162_v45 = vld [vmem:[%s2620_s3] ss:$0 sm:$0xff] (!%p278_p2) }
   0xd   : > { %s2627_s28 = smov (!%p323_p3, %s1579_s28), 1  ;;  %1738 = vmatpush3.bf16.msra.mxu1 %v466_v13 }
   0xe   : > { %s1917_s23 = smul.u32 24, %s2627_s28  ;;  %1739 = vmatprep.subr.bf16.mxu1 %v1956_v6  ;;  %s1628_s16 = sshll.u32 %s2627_s28, 4 }
   0xf   : > { %s2175_s19 = scalar_lea.vmem %s2619_s2, %s1628_s16  ;;  %s340_s21 = scalar_lea.vmem %s2624_s7, %s2627_s28 }
  0x10   : > { %s2068_s10 = scalar_lea.vmem %s2617_s0, %s1917_s23  ;;  %v2180_v60 = vld [vmem:[%s2175_s19] sm:$0xff]  ;;  %s1629_s22 = sshll.u32 %s2627_s28, 7 }
  0x11   : > { %v346_v16 = vld [vmem:[%s2068_s10] sm:$0xff]  ;;  %v347_v20 = vld [vmem:[%s2068_s10 + $0x8] sm:$0xff]  ;;  %1740 = vmatpush3.bf16.msra.mxu1 %v467_v17  ;;  %v348_v55 = vld [vmem:[%s2068_s10 + $0x10] sm:$0xff]  ;;  %s2565_s25 = scalar_lea.vmem %s2623_s6, %s1629_s22  ;;  %s1589_s26 = sshll.u32 %s2627_s28, 3 }
  0x12   : > { %1727 = vmatmul.mubr.msk.f32.vlgmr.msra.gmra.mrb[0].mxu0 %vm353_vm1, %v346_v16  ;;  %1741 = vmatprep.subr.bf16.mxu1 %v1956_v6  ;;  %s344_s9 = scalar_lea.vmem %s2625_s8, %s1589_s26 }
  0x13   : > { %1729 = vmatprep.mubr.msk.f32.mxu0 %vm1955_vm0, %v1956_v6 }
  0x15   : > { %1742 = vmatpush3.bf16.msra.mxu1 %v468_v21 }
  0x16   : > { %1730 = vmatmul.mubr.msk.f32.gmra.mrb[2].mxu0 %vm353_vm1, %v347_v20  ;;  %1743 = vmatprep.subr.bf16.mxu1 %v1956_v6 }
  0x17   : > { %1732 = vmatprep.mubr.msk.f32.mxu0 %vm1955_vm0, %v1956_v6 }
  0x19   : > { %1744 = vmatpush3.bf16.msra.mxu1 %v469_v24 }
  0x1a   : > { %1745 = vmatprep.subr.bf16.mxu1 %v1956_v6  ;;  %1733 = vmatmul.mubr.msk.f32.gmra.mrb[4].mxu0 %vm353_vm1, %v348_v55 }
  0x1d   : > { %1746 = vmatpush3.bf16.msra.mxu1 %v470_v27 }
  0x1e   : > { %1747 = vmatprep.subr.bf16.mxu1 %v1956_v6 }
  0x21   : > { %1748 = vmatpush3.bf16.msra.mxu1 %v471_v30 }
  0x22   : > { %1749 = vmatprep.subr.bf16.mxu1 %v1956_v6 }
  0x25   : > { %1750 = vmatpush3.bf16.msra.mxu1 %v472_v33 }
  0xe5   : > { %v429_v34 = vpop.f32.mrb[0].mxu0 }
  0xe6   : > { %v1728_v35 = vpop.f32.mrb[1].mxu0 }
  0xe9   : > { %v434_v36 = vpop.f32.mrb[2].mxu0 }
  0xea   : > { %v2146_v37 = vpack.c.bf16 %v434_v36, %v429_v34  ;;  %v1731_v38 = vpop.f32.mrb[3].mxu0 }
  0xec   : > { %538 = vxpose.xlu1.c.b16.start.end [1/1] (short) %v2146_v37, 128  ;;  %1752 = vmatmul.mubr.bf16.vlgmr.msra.gmra.mrb[0].mxu1 %v2146_v37 }
  0xed   : > { %v2218_v13 = vpop.f32.mrb[4].mxu0 }
  0xee   : > { %v1734_v16 = vpop.f32.mrb[5].mxu0 }
 0x152   : > { %v2167_v56 = vpop.trf.xlu1 }
 0x153   : > { %1757 = vmatprep.mubr.msk.bf16.mxu0 %vm554_vm2, %v2167_v56 }
 0x156   : > { %v2177_v58 = vpop.trf.xlu1 }
 0x15a   : > { %v2183_v63 = vpop.trf.xlu1 }
 0x15e   : > { %v2191_v3 = vpop.trf.xlu1 }
 0x162   : > { %v2198_v4 = vpop.trf.xlu1 }
 0x166   : > { %v2202_v5 = vpop.trf.xlu1 }
 0x16a   : > { %v2206_v9 = vpop.trf.xlu1 }
 0x16e   : > { %v2212_v12 = vpop.trf.xlu1 }
 0x1bf   : > { %v513_v44 = vpop.f32.mrb[0].mxu1 }
 0x1c0   : > { %v514_v46 = vadd.f32 %v513_v44, %v477_v43  ;;  %v1753_v47 = vpop.f32.mrb[1].mxu1 }
 0x1c1   : > { %v516_v48 = vpop.f32.mrb[2].mxu1 }
 0x1c2   : > { %v1754_v49 = vpop.f32.mrb[3].mxu1  ;;  %v525_v50 = vadd.f32 %v2162_v45, %v514_v46 }
 0x1c4   : > { %526 = vmax.xlane.f32.xlu0 %v525_v50 }
 0x251   : > { %v527_v51 = vpop.xlane.xlu0 %526 }
 0x252   : > { %v528_v52 = vsub.f32 %v525_v50, %v527_v51 }
 0x254   : > { %v529_v53 = vmul.f32 1.442695, %v528_v52 }
 0x256   : > { %1930 = vpow2.f32 %v529_v53 }
 0x260   : > { %v1931_v54 = vpop.eup %1930 }
 0x261   : > { %531 = vadd.xlane.f32.xlu0 %v1931_v54 }
 0x2ee   : > { %v532_v57 = vpop.xlane.xlu0 %531 }
 0x2ef   : > { %1932 = vrcp.f32 %v532_v57 }
 0x2f9   : > { %v1933_v59 = vpop.eup %1932 }
 0x2fa   : > { %v534_v61 = vmul.f32 %v1933_v59, %v1931_v54 }
 0x2fc   : > { %v535_v62 = vsub.f32 %v534_v61, %v2180_v60 }
 0x2fe   : > { %v2185_v0 = vmul.f32 0.125, %v535_v62 }
 0x300   : > { %v537_v1 = vpack.c.bf16 %v2185_v0, %v2185_v0 }
 0x302   : > { %1913 = vmatprep.subr.msk.bf16.mxu0 %vm579_vm3, %v537_v1  ;;  %v581_v2 = vsel %vm579_vm3, %v537_v1, 0 }
 0x303   : > { %1756 = vmatpush3.bf16.msra.mxu0 %v581_v2 }
 0x304   : > { %1773 = vmatprep.subr.bf16.mxu0 %v1956_v6 }
 0x306   : > { %1758 = vmatmul.mubr.msk.bf16.vlgmr.msra.gmra.mrb[8].mxu0 %vm554_vm2, %v2177_v58 }
 0x307   : > { %1761 = vmatprep.mubr.msk.bf16.mxu0 %vm554_vm2, %v2183_v63 }
 0x30e   : > { %1762 = vmatmul.mubr.msk.bf16.gmra.mrb[12].mxu0 %vm554_vm2, %v2191_v3 }
 0x30f   : > { %1765 = vmatprep.mubr.msk.bf16.mxu0 %vm554_vm2, %v2198_v4 }
 0x316   : > { %1766 = vmatmul.mubr.msk.bf16.gmra.mrb[16].mxu0 %vm554_vm2, %v2202_v5 }
 0x317   : > { %1769 = vmatprep.mubr.msk.bf16.mxu0 %vm554_vm2, %v2206_v9 }
 0x31e   : > { %1770 = vmatmul.mubr.msk.bf16.gmra.mrb[20].mxu0 %vm554_vm2, %v2212_v12 }
 0x31f   : > { %1789 = vmatprep.mubr.msk.bf16.mxu0 %vm1955_vm0, %v1956_v6 }
 0x3d9   : > { %v1759_v17 = vpop.f32.mrb[8].mxu0 }
 0x3da   : > { %v617_v20 = vpop.f32.mrb[9].mxu0  ;;  %v688_v34 = vmul.f32 0.1, %v1759_v17 }
 0x3db   : > { %v686_v21 = vmul.f32 0.1, %v617_v20  ;;  %v1760_v24 = vpop.f32.mrb[10].mxu0 }
 0x3dc   : > { %v620_v27 = vpop.f32.mrb[11].mxu0  ;;  %v689_v30 = vmul.f32 0.1, %v1760_v24  ;;  %v2232_v44 = vsub.f32 %v2040_v10, %v688_v34 }
 0x3dd   : > { %v687_v33 = vmul.f32 0.1, %v620_v27  ;;  %v2221_v35 = vsub.f32 %v2027_v7, %v686_v21 }
 0x3de   : > { %v2227_v38 = vsub.f32 %v2045_v11, %v689_v30 }
 0x3df   : > { %v2224_v36 = vsub.f32 %v2032_v8, %v687_v33 }
 0x3e0   : > { %v721_v7 = vpack.c.bf16 %v2227_v38, %v2232_v44 }
 0x3e1   : > { %v720_v39 = vpack.c.bf16 %v2224_v36, %v2221_v35  ;;  %v1763_v40 = vpop.f32.mrb[12].mxu0 }
 0x3e2   : > { %v633_v43 = vpop.f32.mrb[13].mxu0  ;;  %v692_v49 = vmul.f32 0.1, %v1763_v40 }
 0x3e3   : > { %v690_v46 = vmul.f32 0.1, %v633_v43  ;;  %v1764_v47 = vpop.f32.mrb[14].mxu0  ;;  %1774 = vmatpush3.bf16.msra.mxu0 %v720_v39 }
 0x3e4   : > { %v636_v48 = vpop.f32.mrb[15].mxu0  ;;  %1775 = vmatprep.subr.bf16.mxu0 %v1956_v6  ;;  %v693_v8 = vmul.f32 0.1, %v1764_v47  ;;  %v2250_v55 = vsub.f32 %v2077_v18, %v692_v49 }
 0x3e5   : > { %v691_v11 = vmul.f32 0.1, %v636_v48  ;;  %v2238_v50 = vsub.f32 %v2058_v14, %v690_v46 }
 0x3e6   : > { %v2245_v10 = vsub.f32 %v2082_v19, %v693_v8 }
 0x3e7   : > { %v2241_v51 = vsub.f32 %v2063_v15, %v691_v11  ;;  %1776 = vmatpush3.bf16.msra.mxu0 %v721_v7 }
 0x3e8   : > { %1777 = vmatprep.subr.bf16.mxu0 %v1956_v6  ;;  %v723_v15 = vpack.c.bf16 %v2245_v10, %v2250_v55 }
 0x3e9   : > { %v722_v52 = vpack.c.bf16 %v2241_v51, %v2238_v50  ;;  %v1767_v53 = vpop.f32.mrb[16].mxu0 }
 0x3ea   : > { %v649_v54 = vpop.f32.mrb[17].mxu0  ;;  %v696_v62 = vmul.f32 0.1, %v1767_v53 }
 0x3eb   : > { %v694_v57 = vmul.f32 0.1, %v649_v54  ;;  %v1768_v14 = vpop.f32.mrb[18].mxu0  ;;  %1778 = vmatpush3.bf16.msra.mxu0 %v722_v52 }
 0x3ec   : > { %v652_v59 = vpop.f32.mrb[19].mxu0  ;;  %1779 = vmatprep.subr.bf16.mxu0 %v1956_v6  ;;  %v697_v61 = vmul.f32 0.1, %v1768_v14  ;;  %v2268_v21 = vsub.f32 %v2110_v25, %v696_v62 }
 0x3ed   : > { %v695_v19 = vmul.f32 0.1, %v652_v59  ;;  %v2256_v1 = vsub.f32 %v2094_v22, %v694_v57 }
 0x3ee   : > { %v2263_v18 = vsub.f32 %v2115_v26, %v697_v61 }
 0x3ef   : > { %v2259_v2 = vsub.f32 %v2099_v23, %v695_v19  ;;  %1780 = vmatpush3.bf16.msra.mxu0 %v723_v15 }
 0x3f0   : > { %1781 = vmatprep.subr.bf16.mxu0 %v1956_v6  ;;  %v725_v23 = vpack.c.bf16 %v2263_v18, %v2268_v21 }
 0x3f1   : > { %v724_v16 = vpack.c.bf16 %v2259_v2, %v2256_v1  ;;  %v1771_v17 = vpop.f32.mrb[20].mxu0 }
 0x3f2   : > { %v665_v20 = vpop.f32.mrb[21].mxu0  ;;  %v700_v33 = vmul.f32 0.1, %v1771_v17  ;;  %v2313_v17 = vld [vmem:[%s2175_s19 + $0x8] sm:$0xff] }
 0x3f3   : > { %v698_v24 = vmul.f32 0.1, %v665_v20  ;;  %v1772_v22 = vpop.f32.mrb[22].mxu0  ;;  %1782 = vmatpush3.bf16.msra.mxu0 %v724_v16 }
 0x3f4   : > { %v668_v27 = vpop.f32.mrb[23].mxu0  ;;  %1783 = vmatprep.subr.bf16.mxu0 %v1956_v6  ;;  %v701_v30 = vmul.f32 0.1, %v1772_v22  ;;  %v2286_v43 = vsub.f32 %v2137_v31, %v700_v33 }
 0x3f5   : > { %v699_v26 = vmul.f32 0.1, %v668_v27  ;;  %v2274_v34 = vsub.f32 %v2124_v28, %v698_v24 }
 0x3f6   : > { %v2281_v25 = vsub.f32 %v2142_v32, %v701_v30  ;;  %v680_v32 = vrot.slane %v2185_v0, 4 }
 0x3f7   : > { %v2277_v39 = vsub.f32 %v2129_v29, %v699_v26  ;;  %1784 = vmatpush3.bf16.msra.mxu0 %v725_v23  ;;  %v2292_v29 = vrot.slane %v2146_v37, 4 }
 0x3f8   : > { %1785 = vmatprep.subr.bf16.mxu0 %v1956_v6  ;;  %v727_v28 = vpack.c.bf16 %v2281_v25, %v2286_v43  ;;  %v681_v31 = vadd.f32 %v680_v32, %v2185_v0 }
 0x3f9   : > { %v726_v40 = vpack.c.bf16 %v2277_v39, %v2274_v34 }
 0x3fa   : > { %v682_v46 = vrot.slane %v681_v31, 2 }
 0x3fb   : > { %1786 = vmatpush3.bf16.msra.mxu0 %v726_v40 }
 0x3fc   : > { %1787 = vmatprep.subr.bf16.mxu0 %v1956_v6  ;;  %v683_v47 = vadd.f32 %v682_v46, %v681_v31 }
 0x3fe   : > { %v684_v48 = vrot.slane %v683_v47, 1 }
 0x3ff   : > { %1788 = vmatpush3.bf16.msra.mxu0 %v727_v28 }
 0x400   : > { %v685_v7 = vadd.f32 %v684_v48, %v683_v47 }
 0x402   : > { %1790 = vmatmul.mubr.bf16.vlgmr.msra.gmra.mrb[24].mxu0 %v2292_v29  ;;  %v718_v8 = vmul.f32 0.1, %v685_v7 }
 0x403   : > { %1833 = vmatprep.mubr.msk.bf16.mxu0 %vm554_vm2, %v2167_v56 }
 0x404   : > { %v2300_v11 = vsub.f32 %v2155_v42, %v718_v8 }
 0x406   : > { %v732_v49 = vrot.slane %v2300_v11, %v2150_v41 }
 0x4d5   : > { %v771_v52 = vpop.f32.mrb[24].mxu0 }
 0x4d6   : > { %v772_v53 = vadd.f32 %v771_v52, %v732_v49  ;;  %v1791_v54 = vpop.f32.mrb[25].mxu0 }
 0x4d7   : > { %v774_v57 = vpop.f32.mrb[26].mxu0 }
 0x4d8   : > { %v1792_v56 = vpop.f32.mrb[27].mxu0  ;;  %v777_v14 = vadd.f32 %v2162_v45, %v772_v53 }
 0x4da   : > { %778 = vmax.xlane.f32.xlu1 %v777_v14 }
 0x567   : > { %v779_v0 = vpop.xlane.xlu1 %778 }
 0x568   : > { %v780_v59 = vsub.f32 %v777_v14, %v779_v0 }
 0x56a   : > { %v781_v15 = vmul.f32 1.442695, %v780_v59 }
 0x56c   : > { %1934 = vpow2.f32 %v781_v15 }
 0x576   : > { %v1935_v61 = vpop.eup %1934 }
 0x577   : > { %783 = vadd.xlane.f32.xlu0 %v1935_v61 }
 0x5a4   : > { %790 = vxpose.xlu0.c.b16.start.end [1/1] (short) %v2292_v29, 128 }
 0x604   : > { %v784_v42 = vpop.xlane.xlu0 %783 }
 0x605   : > { %1936 = vrcp.f32 %v784_v42 }
 0x60a   : > { %v2306_v19 = vpop.trf.xlu0 }
 0x60b   : > { %1795 = vmatprep.mubr.msk.bf16.mxu1 %vm554_vm2, %v2306_v19 }
 0x60e   : > { %v2310_v62 = vpop.trf.xlu0 }
 0x60f   : > { %v1937_v16 = vpop.eup %1936 }
 0x610   : > { %v786_v20 = vmul.f32 %v1937_v16, %v1935_v61 }
 0x612   : > { %v787_v24 = vsub.f32 %v786_v20, %v2313_v17  ;;  %v2316_v22 = vpop.trf.xlu0 }
 0x614   : > { %v2318_v27 = vmul.f32 0.125, %v787_v24 }
 0x616   : > { %v789_v23 = vpack.c.bf16 %v2318_v27, %v2318_v27  ;;  %v2324_v26 = vpop.trf.xlu0 }
 0x618   : > { %1914 = vmatprep.subr.msk.bf16.mxu1 %vm579_vm3, %v789_v23  ;;  %v831_v30 = vsel %vm579_vm3, %v789_v23, 0 }
 0x619   : > { %1794 = vmatpush3.bf16.msra.mxu1 %v831_v30 }
 0x61a   : > { %1811 = vmatprep.subr.bf16.mxu1 %v1956_v6  ;;  %v2331_v33 = vpop.trf.xlu0 }
 0x61c   : > { %1796 = vmatmul.mubr.msk.bf16.vlgmr.msra.gmra.mrb[4].mxu1 %vm554_vm2, %v2310_v62 }
 0x61d   : > { %1799 = vmatprep.mubr.msk.bf16.mxu1 %vm554_vm2, %v2316_v22 }
 0x61e   : > { %v2335_v40 = vpop.trf.xlu0 }
 0x622   : > { %v2339_v28 = vpop.trf.xlu0 }
 0x624   : > { %1800 = vmatmul.mubr.msk.bf16.gmra.mrb[8].mxu1 %vm554_vm2, %v2324_v26 }
 0x625   : > { %1803 = vmatprep.mubr.msk.bf16.mxu1 %vm554_vm2, %v2331_v33 }
 0x626   : > { %v2345_v32 = vpop.trf.xlu0 }
 0x62c   : > { %1804 = vmatmul.mubr.msk.bf16.gmra.mrb[12].mxu1 %vm554_vm2, %v2335_v40 }
 0x62d   : > { %1807 = vmatprep.mubr.msk.bf16.mxu1 %vm554_vm2, %v2339_v28 }
 0x634   : > { %1808 = vmatmul.mubr.msk.bf16.gmra.mrb[16].mxu1 %vm554_vm2, %v2345_v32 }
 0x635   : > { %1827 = vmatprep.mubr.msk.bf16.mxu1 %vm1955_vm0, %v1956_v6 }
 0x6ef   : > { %v1797_v31 = vpop.f32.mrb[4].mxu1 }
 0x6f0   : > { %v867_v46 = vpop.f32.mrb[5].mxu1  ;;  %v938_v52 = vmul.f32 0.1, %v1797_v31 }
 0x6f1   : > { %v936_v47 = vmul.f32 0.1, %v867_v46  ;;  %v1798_v48 = vpop.f32.mrb[6].mxu1 }
 0x6f2   : > { %v870_v7 = vpop.f32.mrb[7].mxu1  ;;  %v939_v8 = vmul.f32 0.1, %v1798_v48  ;;  %v2363_v59 = vsub.f32 %v2232_v44, %v938_v52 }
 0x6f3   : > { %v937_v49 = vmul.f32 0.1, %v870_v7  ;;  %v2352_v53 = vsub.f32 %v2221_v35, %v936_v47 }
 0x6f4   : > { %v2358_v57 = vsub.f32 %v2227_v38, %v939_v8 }
 0x6f5   : > { %v2355_v54 = vsub.f32 %v2224_v36, %v937_v49 }
 0x6f6   : > { %v971_v35 = vpack.c.bf16 %v2358_v57, %v2363_v59 }
 0x6f7   : > { %v970_v56 = vpack.c.bf16 %v2355_v54, %v2352_v53  ;;  %v1801_v14 = vpop.f32.mrb[8].mxu1 }
 0x6f8   : > { %v883_v0 = vpop.f32.mrb[9].mxu1  ;;  %v942_v16 = vmul.f32 0.1, %v1801_v14 }
 0x6f9   : > { %v940_v15 = vmul.f32 0.1, %v883_v0  ;;  %v1802_v61 = vpop.f32.mrb[10].mxu1  ;;  %1812 = vmatpush3.bf16.msra.mxu1 %v970_v56 }
 0x6fa   : > { %v886_v42 = vpop.f32.mrb[11].mxu1  ;;  %1813 = vmatprep.subr.bf16.mxu1 %v1956_v6  ;;  %v943_v36 = vmul.f32 0.1, %v1802_v61  ;;  %v2381_v46 = vsub.f32 %v2250_v55, %v942_v16 }
 0x6fb   : > { %v941_v38 = vmul.f32 0.1, %v886_v42  ;;  %v2369_v20 = vsub.f32 %v2238_v50, %v940_v15 }
 0x6fc   : > { %v2376_v44 = vsub.f32 %v2245_v10, %v943_v36 }
 0x6fd   : > { %v2372_v24 = vsub.f32 %v2241_v51, %v941_v38  ;;  %1814 = vmatpush3.bf16.msra.mxu1 %v971_v35 }
 0x6fe   : > { %1815 = vmatprep.subr.bf16.mxu1 %v1956_v6  ;;  %v973_v51 = vpack.c.bf16 %v2376_v44, %v2381_v46 }
 0x6ff   : > { %v972_v23 = vpack.c.bf16 %v2372_v24, %v2369_v20  ;;  %v1805_v30 = vpop.f32.mrb[12].mxu1 }
 0x700   : > { %v899_v31 = vpop.f32.mrb[13].mxu1  ;;  %v946_v8 = vmul.f32 0.1, %v1805_v30 }
 0x701   : > { %v944_v47 = vmul.f32 0.1, %v899_v31  ;;  %v1806_v50 = vpop.f32.mrb[14].mxu1  ;;  %1816 = vmatpush3.bf16.msra.mxu1 %v972_v23 }
 0x702   : > { %v902_v48 = vpop.f32.mrb[15].mxu1  ;;  %1817 = vmatprep.subr.bf16.mxu1 %v1956_v6  ;;  %v947_v7 = vmul.f32 0.1, %v1806_v50  ;;  %v2399_v15 = vsub.f32 %v2268_v21, %v946_v8 }
 0x703   : > { %v945_v10 = vmul.f32 0.1, %v902_v48  ;;  %v2387_v49 = vsub.f32 %v2256_v1, %v944_v47 }
 0x704   : > { %v2394_v55 = vsub.f32 %v2263_v18, %v947_v7 }
 0x705   : > { %v2390_v52 = vsub.f32 %v2259_v2, %v945_v10  ;;  %1818 = vmatpush3.bf16.msra.mxu1 %v973_v51 }
 0x706   : > { %1819 = vmatprep.subr.bf16.mxu1 %v1956_v6  ;;  %v975_v2 = vpack.c.bf16 %v2394_v55, %v2399_v15 }
 0x707   : > { %v974_v56 = vpack.c.bf16 %v2390_v52, %v2387_v49  ;;  %v1809_v14 = vpop.f32.mrb[16].mxu1 }
 0x708   : > { %v915_v0 = vpop.f32.mrb[17].mxu1  ;;  %v950_v36 = vmul.f32 0.1, %v1809_v14 }
 0x709   : > { %v948_v61 = vmul.f32 0.1, %v915_v0  ;;  %v1810_v1 = vpop.f32.mrb[18].mxu1  ;;  %1820 = vmatpush3.bf16.msra.mxu1 %v974_v56 }
 0x70a   : > { %v918_v42 = vpop.f32.mrb[19].mxu1  ;;  %1821 = vmatprep.subr.bf16.mxu1 %v1956_v6  ;;  %v951_v35 = vmul.f32 0.1, %v1810_v1  ;;  %v2417_v30 = vsub.f32 %v2286_v43, %v950_v36 }
 0x70b   : > { %v949_v18 = vmul.f32 0.1, %v918_v42  ;;  %v2405_v38 = vsub.f32 %v2274_v34, %v948_v61 }
 0x70c   : > { %v2412_v21 = vsub.f32 %v2281_v25, %v951_v35 }
 0x70d   : > { %v2408_v16 = vsub.f32 %v2277_v39, %v949_v18  ;;  %1822 = vmatpush3.bf16.msra.mxu1 %v975_v2  ;;  %v930_v39 = vrot.slane %v2318_v27, 4 }
 0x70e   : > { %1823 = vmatprep.subr.bf16.mxu1 %v1956_v6  ;;  %v977_v34 = vpack.c.bf16 %v2412_v21, %v2417_v30 }
 0x70f   : > { %v976_v23 = vpack.c.bf16 %v2408_v16, %v2405_v38  ;;  %v931_v25 = vadd.f32 %v930_v39, %v2318_v27 }
 0x711   : > { %1824 = vmatpush3.bf16.msra.mxu1 %v976_v23  ;;  %v932_v31 = vrot.slane %v931_v25, 2 }
 0x712   : > { %1825 = vmatprep.subr.bf16.mxu1 %v1956_v6 }
 0x713   : > { %v933_v47 = vadd.f32 %v932_v31, %v931_v25 }
 0x715   : > { %1826 = vmatpush3.bf16.msra.mxu1 %v977_v34  ;;  %v934_v43 = vrot.slane %v933_v47, 1 }
 0x717   : > { %v935_v50 = vadd.f32 %v934_v43, %v933_v47 }
 0x718   : > { %1828 = vmatmul.mubr.bf16.vlgmr.msra.gmra.mrb[20].mxu1 %v2146_v37 }
 0x719   : > { %1871 = vmatprep.mubr.msk.bf16.mxu1 %vm554_vm2, %v2306_v19  ;;  %v968_v48 = vmul.f32 0.1, %v935_v50 }
 0x71b   : > { %v2428_v51 = vsub.f32 %v2300_v11, %v968_v48 }
 0x71d   : > { %v982_v7 = vrot.slane %v2428_v51, %v2150_v41 }
 0x7eb   : > { %v1018_v10 = vpop.f32.mrb[20].mxu1 }
 0x7ec   : > { %v1019_v37 = vadd.f32 %v1018_v10, %v982_v7  ;;  %v1829_v8 = vpop.f32.mrb[21].mxu1 }
 0x7ed   : > { %v1021_v56 = vpop.f32.mrb[22].mxu1 }
 0x7ee   : > { %v1830_v19 = vpop.f32.mrb[23].mxu1  ;;  %v1024_v14 = vadd.f32 %v2162_v45, %v1019_v37 }
 0x7f0   : > { %1025 = vmax.xlane.f32.xlu1 %v1024_v14 }
 0x87d   : > { %v1026_v27 = vpop.xlane.xlu1 %1025 }
 0x87e   : > { %v1027_v0 = vsub.f32 %v1024_v14, %v1026_v27 }
 0x880   : > { %v1028_v61 = vmul.f32 1.442695, %v1027_v0 }
 0x882   : > { %1938 = vpow2.f32 %v1028_v61 }
 0x88c   : > { %v1939_v1 = vpop.eup %1938 }
 0x88d   : > { %1030 = vadd.xlane.f32.xlu1 %v1939_v1 }
 0x91a   : > { %v1031_v42 = vpop.xlane.xlu1 %1030 }
 0x91b   : > { %1940 = vrcp.f32 %v1031_v42 }
 0x925   : > { %v1941_v11 = vpop.eup %1940 }
 0x926   : > { %v1033_v2 = vmul.f32 %v1941_v11, %v1939_v1 }
 0x928   : > { %v1034_v35 = vsub.f32 %v1033_v2, %v2180_v60 }
 0x92a   : > { %v2434_v18 = vmul.f32 0.125, %v1034_v35 }
 0x92c   : > { %v1036_v36 = vpack.c.bf16 %v2434_v18, %v2434_v18 }
 0x92e   : > { %1915 = vmatprep.subr.msk.bf16.mxu0 %vm579_vm3, %v1036_v36  ;;  %v1038_v23 = vsel %vm579_vm3, %v1036_v36, 0 }
 0x92f   : > { %1832 = vmatpush3.bf16.msra.mxu0 %v1038_v23 }
 0x930   : > { %1849 = vmatprep.subr.bf16.mxu0 %v1956_v6 }
 0x932   : > { %1834 = vmatmul.mubr.msk.bf16.vlgmr.msra.gmra.mrb[28].mxu0 %vm554_vm2, %v2177_v58 }
 0x933   : > { %1837 = vmatprep.mubr.msk.bf16.mxu0 %vm554_vm2, %v2183_v63 }
 0x93a   : > { %1838 = vmatmul.mubr.msk.bf16.gmra.mrb[32].mxu0 %vm554_vm2, %v2191_v3 }
 0x93b   : > { %1841 = vmatprep.mubr.msk.bf16.mxu0 %vm554_vm2, %v2198_v4 }
 0x942   : > { %1842 = vmatmul.mubr.msk.bf16.gmra.mrb[36].mxu0 %vm554_vm2, %v2202_v5 }
 0x943   : > { %1845 = vmatprep.mubr.msk.bf16.mxu0 %vm554_vm2, %v2206_v9 }
 0x94a   : > { %1846 = vmatmul.mubr.msk.bf16.gmra.mrb[40].mxu0 %vm554_vm2, %v2212_v12 }
 0x94b   : > { %1865 = vmatprep.mubr.msk.bf16.mxu0 %vm1955_vm0, %v1956_v6 }
 0xa05   : > { %v1835_v58 = vpop.f32.mrb[28].mxu0 }
 0xa06   : > { %v1074_v60 = vpop.f32.mrb[29].mxu0  ;;  %v1145_v4 = vmul.f32 0.1, %v1835_v58 }
 0xa07   : > { %v1143_v63 = vmul.f32 0.1, %v1074_v60  ;;  %v1836_v34 = vpop.f32.mrb[30].mxu0 }
 0xa08   : > { %v1077_v3 = vpop.f32.mrb[31].mxu0  ;;  %v1146_v39 = vmul.f32 0.1, %v1836_v34  ;;  %v2469_v50 = vsub.f32 %v2363_v59, %v1145_v4 }
 0xa09   : > { %v1144_v25 = vmul.f32 0.1, %v1077_v3  ;;  %v2458_v31 = vsub.f32 %v2352_v53, %v1143_v63 }
 0xa0a   : > { %v2464_v9 = vsub.f32 %v2358_v57, %v1146_v39 }
 0xa0b   : > { %v2461_v5 = vsub.f32 %v2355_v54, %v1144_v25 }
 0xa0c   : > { %v1178_v53 = vpack.c.bf16 %v2464_v9, %v2469_v50 }
 0xa0d   : > { %v1177_v12 = vpack.c.bf16 %v2461_v5, %v2458_v31  ;;  %v1839_v47 = vpop.f32.mrb[32].mxu0 }
 0xa0e   : > { %v1090_v43 = vpop.f32.mrb[33].mxu0  ;;  %v1149_v37 = vmul.f32 0.1, %v1839_v47 }
 0xa0f   : > { %v1147_v48 = vmul.f32 0.1, %v1090_v43  ;;  %v1840_v7 = vpop.f32.mrb[34].mxu0  ;;  %1850 = vmatpush3.bf16.msra.mxu0 %v1177_v12 }
 0xa10   : > { %v1093_v10 = vpop.f32.mrb[35].mxu0  ;;  %1851 = vmatprep.subr.bf16.mxu0 %v1956_v6  ;;  %v1150_v54 = vmul.f32 0.1, %v1840_v7  ;;  %v2487_v0 = vsub.f32 %v2381_v46, %v1149_v37 }
 0xa11   : > { %v1148_v57 = vmul.f32 0.1, %v1093_v10  ;;  %v2475_v8 = vsub.f32 %v2369_v20, %v1147_v48 }
 0xa12   : > { %v2482_v59 = vsub.f32 %v2376_v44, %v1150_v54 }
 0xa13   : > { %v2478_v56 = vsub.f32 %v2372_v24, %v1148_v57  ;;  %1852 = vmatpush3.bf16.msra.mxu0 %v1178_v53 }
 0xa14   : > { %1853 = vmatprep.subr.bf16.mxu0 %v1956_v6  ;;  %v1180_v24 = vpack.c.bf16 %v2482_v59, %v2487_v0 }
 0xa15   : > { %v1179_v19 = vpack.c.bf16 %v2478_v56, %v2475_v8  ;;  %v1843_v14 = vpop.f32.mrb[36].mxu0 }
 0xa16   : > { %v1106_v27 = vpop.f32.mrb[37].mxu0  ;;  %v1153_v11 = vmul.f32 0.1, %v1843_v14 }
 0xa17   : > { %v1151_v61 = vmul.f32 0.1, %v1106_v27  ;;  %v1844_v20 = vpop.f32.mrb[38].mxu0  ;;  %1854 = vmatpush3.bf16.msra.mxu0 %v1179_v19 }
 0xa18   : > { %v1109_v1 = vpop.f32.mrb[39].mxu0  ;;  %1855 = vmatprep.subr.bf16.mxu0 %v1956_v6  ;;  %v1154_v42 = vmul.f32 0.1, %v1844_v20  ;;  %v2505_v60 = vsub.f32 %v2399_v15, %v1153_v11 }
 0xa19   : > { %v1152_v44 = vmul.f32 0.1, %v1109_v1  ;;  %v2493_v2 = vsub.f32 %v2387_v49, %v1151_v61 }
 0xa1a   : > { %v2500_v46 = vsub.f32 %v2394_v55, %v1154_v42 }
 0xa1b   : > { %v2496_v35 = vsub.f32 %v2390_v52, %v1152_v44  ;;  %1856 = vmatpush3.bf16.msra.mxu0 %v1180_v24 }
 0xa1c   : > { %1857 = vmatprep.subr.bf16.mxu0 %v1956_v6  ;;  %v1182_v52 = vpack.c.bf16 %v2500_v46, %v2505_v60 }
 0xa1d   : > { %v1181_v36 = vpack.c.bf16 %v2496_v35, %v2493_v2  ;;  %v1847_v23 = vpop.f32.mrb[40].mxu0 }
 0xa1e   : > { %v1122_v58 = vpop.f32.mrb[41].mxu0  ;;  %v1157_v39 = vmul.f32 0.1, %v1847_v23 }
 0xa1f   : > { %v1155_v63 = vmul.f32 0.1, %v1122_v58  ;;  %v1848_v49 = vpop.f32.mrb[42].mxu0  ;;  %1858 = vmatpush3.bf16.msra.mxu0 %v1181_v36 }
 0xa20   : > { %v1125_v34 = vpop.f32.mrb[43].mxu0  ;;  %1859 = vmatprep.subr.bf16.mxu0 %v1956_v6  ;;  %v1158_v3 = vmul.f32 0.1, %v1848_v49  ;;  %v2523_v47 = vsub.f32 %v2417_v30, %v1157_v39 }
 0xa21   : > { %v1156_v55 = vmul.f32 0.1, %v1125_v34  ;;  %v2511_v25 = vsub.f32 %v2405_v38, %v1155_v63 }
 0xa22   : > { %v2518_v15 = vsub.f32 %v2412_v21, %v1158_v3 }
 0xa23   : > { %v2514_v4 = vsub.f32 %v2408_v16, %v1156_v55  ;;  %1860 = vmatpush3.bf16.msra.mxu0 %v1182_v52  ;;  %v1137_v16 = vrot.slane %v2434_v18, 4 }
 0xa24   : > { %1861 = vmatprep.subr.bf16.mxu0 %v1956_v6  ;;  %v1184_v38 = vpack.c.bf16 %v2518_v15, %v2523_v47 }
 0xa25   : > { %v1183_v12 = vpack.c.bf16 %v2514_v4, %v2511_v25  ;;  %v1138_v21 = vadd.f32 %v1137_v16, %v2434_v18 }
 0xa27   : > { %1862 = vmatpush3.bf16.msra.mxu0 %v1183_v12  ;;  %v1139_v43 = vrot.slane %v1138_v21, 2 }
 0xa28   : > { %1863 = vmatprep.subr.bf16.mxu0 %v1956_v6 }
 0xa29   : > { %v1140_v48 = vadd.f32 %v1139_v43, %v1138_v21 }
 0xa2b   : > { %1864 = vmatpush3.bf16.msra.mxu0 %v1184_v38  ;;  %v1141_v7 = vrot.slane %v1140_v48, 1 }
 0xa2d   : > { %v1142_v10 = vadd.f32 %v1141_v7, %v1140_v48 }
 0xa2e   : > { %1866 = vmatmul.mubr.bf16.vlgmr.msra.gmra.mrb[44].mxu0 %v2292_v29 }
 0xa2f   : > { %v1175_v53 = vmul.f32 0.1, %v1142_v10 }
 0xa31   : > { %v1176_v30 = vsub.f32 %v2428_v51, %v1175_v53 }
 0xa33   : > { %v1189_v54 = vrot.slane %v1176_v30, %v2150_v41 }
 0xb01   : > { %v1225_v57 = vpop.f32.mrb[44].mxu0 }
 0xb02   : > { %v1226_v37 = vadd.f32 %v1225_v57, %v1189_v54  ;;  %v1867_v19 = vpop.f32.mrb[45].mxu0 }
 0xb03   : > { %v1228_v14 = vpop.f32.mrb[46].mxu0 }
 0xb04   : > { %v1868_v27 = vpop.f32.mrb[47].mxu0  ;;  %v1231_v29 = vadd.f32 %v2162_v45, %v1226_v37 }
 0xb06   : > { %1232 = vmax.xlane.f32.xlu1 %v1231_v29 }
 0xb93   : > { %v1233_v61 = vpop.xlane.xlu1 %1232 }
 0xb94   : > { %v1234_v20 = vsub.f32 %v1231_v29, %v1233_v61 }
 0xb96   : > { %v1235_v18 = vmul.f32 1.442695, %v1234_v20 }
 0xb98   : > { %1942 = vpow2.f32 %v1235_v18 }
 0xba2   : > { %v1943_v1 = vpop.eup %1942 }
 0xba3   : > { %1237 = vadd.xlane.f32.xlu0 %v1943_v1 }
 0xc30   : > { %v1238_v24 = vpop.xlane.xlu0 %1237 }
 0xc31   : > { %1944 = vrcp.f32 %v1238_v24 }
 0xc3b   : > { %v1945_v42 = vpop.eup %1944 }
 0xc3c   : > { %v1240_v51 = vmul.f32 %v1945_v42, %v1943_v1 }
 0xc3e   : > { %v1241_v44 = vsub.f32 %v1240_v51, %v2313_v17 }
 0xc40   : > { %v1242_v11 = vmul.f32 0.125, %v1241_v44 }
 0xc42   : > { %v1243_v36 = vpack.c.bf16 %v1242_v11, %v1242_v11  ;;  %v1344_v23 = vrot.slane %v1242_v11, 4 }
 0xc44   : > { %1916 = vmatprep.subr.msk.bf16.mxu1 %vm579_vm3, %v1243_v36  ;;  %v1245_v45 = vsel %vm579_vm3, %v1243_v36, 0  ;;  %v1345_v58 = vadd.f32 %v1344_v23, %v1242_v11 }
 0xc45   : > { %1870 = vmatpush3.bf16.msra.mxu1 %v1245_v45 }
 0xc46   : > { %1887 = vmatprep.subr.bf16.mxu1 %v1956_v6  ;;  %v1346_v63 = vrot.slane %v1345_v58, 2 }
 0xc48   : > { %1872 = vmatmul.mubr.msk.bf16.vlgmr.msra.gmra.mrb[24].mxu1 %vm554_vm2, %v2310_v62  ;;  %v1347_v49 = vadd.f32 %v1346_v63, %v1345_v58 }
 0xc49   : > { %1875 = vmatprep.mubr.msk.bf16.mxu1 %vm554_vm2, %v2316_v22 }
 0xc4a   : > { %v1348_v17 = vrot.slane %v1347_v49, 1 }
 0xc4c   : > { %v1349_v34 = vadd.f32 %v1348_v17, %v1347_v49 }
 0xc4e   : > { %v1382_v52 = vmul.f32 0.1, %v1349_v34 }
 0xc50   : > { %1876 = vmatmul.mubr.msk.bf16.gmra.mrb[28].mxu1 %vm554_vm2, %v2324_v26  ;;  %v2548_v3 = vsub.f32 %v1176_v30, %v1382_v52 }
 0xc51   : > { %1879 = vmatprep.mubr.msk.bf16.mxu1 %vm554_vm2, %v2331_v33 }
 0xc52   : > { %1455 = vst [vmem:[%s340_s21] sm:$0x1] %v2548_v3 }
 0xc58   : > { %1880 = vmatmul.mubr.msk.bf16.gmra.mrb[32].mxu1 %vm554_vm2, %v2335_v40 }
 0xc59   : > { %1883 = vmatprep.mubr.msk.bf16.mxu1 %vm554_vm2, %v2339_v28 }
 0xc60   : > { %1884 = vmatmul.mubr.msk.bf16.gmra.mrb[36].mxu1 %vm554_vm2, %v2345_v32 }
 0xc61   : > { %1903 = vmatprep.mubr.msk.bf16.mxu1 %vm1955_vm0, %v1956_v6 }
 0xd1b   : > { %v1873_v62 = vpop.f32.mrb[24].mxu1 }
 0xd1c   : > { %v1352_v22 = vmul.f32 0.1, %v1873_v62  ;;  %v1281_v26 = vpop.f32.mrb[25].mxu1 }
 0xd1d   : > { %v1350_v33 = vmul.f32 0.1, %v1281_v26  ;;  %v1874_v40 = vpop.f32.mrb[26].mxu1 }
 0xd1e   : > { %v1368_v28 = vsub.f32 %v2469_v50, %v1352_v22  ;;  %v1353_v32 = vmul.f32 0.1, %v1874_v40  ;;  %v1284_v55 = vpop.f32.mrb[27].mxu1 }
 0xd1f   : > { %v1366_v39 = vsub.f32 %v2458_v31, %v1350_v33  ;;  %v1351_v12 = vmul.f32 0.1, %v1284_v55 }
 0xd20   : > { %1441 = vst [vmem:[%s2565_s25 + $0x10] sm:$0xff] %v1368_v28  ;;  %v1369_v38 = vsub.f32 %v2464_v9, %v1353_v32 }
 0xd21   : > { %1439 = vst [vmem:[%s2565_s25] sm:$0xff] %v1366_v39  ;;  %v1367_v16 = vsub.f32 %v2461_v5, %v1351_v12 }
 0xd22   : > { %v1385_v21 = vpack.c.bf16 %v1369_v38, %v1368_v28  ;;  %1442 = vst [vmem:[%s2565_s25 + $0x18] sm:$0xff] %v1369_v38 }
 0xd23   : > { %v1384_v43 = vpack.c.bf16 %v1367_v16, %v1366_v39  ;;  %1440 = vst [vmem:[%s2565_s25 + $0x8] sm:$0xff] %v1367_v16  ;;  %v1877_v48 = vpop.f32.mrb[28].mxu1 }
 0xd24   : > { %v1356_v7 = vmul.f32 0.1, %v1877_v48  ;;  %v1297_v50 = vpop.f32.mrb[29].mxu1 }
 0xd25   : > { %v1354_v10 = vmul.f32 0.1, %v1297_v50  ;;  %v1878_v53 = vpop.f32.mrb[30].mxu1  ;;  %1888 = vmatpush3.bf16.msra.mxu1 %v1384_v43 }
 0xd26   : > { %v1372_v31 = vsub.f32 %v2487_v0, %v1356_v7  ;;  %v1357_v9 = vmul.f32 0.1, %v1878_v53  ;;  %v1300_v30 = vpop.f32.mrb[31].mxu1  ;;  %1889 = vmatprep.subr.bf16.mxu1 %v1956_v6 }
 0xd27   : > { %v1370_v5 = vsub.f32 %v2475_v8, %v1354_v10  ;;  %v1355_v54 = vmul.f32 0.1, %v1300_v30 }
 0xd28   : > { %1445 = vst [vmem:[%s2565_s25 + $0x30] sm:$0xff] %v1372_v31  ;;  %v1373_v57 = vsub.f32 %v2482_v59, %v1357_v9 }
 0xd29   : > { %1443 = vst [vmem:[%s2565_s25 + $0x20] sm:$0xff] %v1370_v5  ;;  %v1371_v37 = vsub.f32 %v2478_v56, %v1355_v54  ;;  %1890 = vmatpush3.bf16.msra.mxu1 %v1385_v21 }
 0xd2a   : > { %v1387_v19 = vpack.c.bf16 %v1373_v57, %v1372_v31  ;;  %1446 = vst [vmem:[%s2565_s25 + $0x38] sm:$0xff] %v1373_v57  ;;  %1891 = vmatprep.subr.bf16.mxu1 %v1956_v6 }
 0xd2b   : > { %v1386_v0 = vpack.c.bf16 %v1371_v37, %v1370_v5  ;;  %1444 = vst [vmem:[%s2565_s25 + $0x28] sm:$0xff] %v1371_v37  ;;  %v1881_v14 = vpop.f32.mrb[32].mxu1 }
 0xd2c   : > { %v1360_v27 = vmul.f32 0.1, %v1881_v14  ;;  %v1313_v29 = vpop.f32.mrb[33].mxu1 }
 0xd2d   : > { %v1358_v8 = vmul.f32 0.1, %v1313_v29  ;;  %v1882_v61 = vpop.f32.mrb[34].mxu1  ;;  %1892 = vmatpush3.bf16.msra.mxu1 %v1386_v0 }
 0xd2e   : > { %v1376_v59 = vsub.f32 %v2505_v60, %v1360_v27  ;;  %v1361_v56 = vmul.f32 0.1, %v1882_v61  ;;  %v1316_v20 = vpop.f32.mrb[35].mxu1  ;;  %1893 = vmatprep.subr.bf16.mxu1 %v1956_v6 }
 0xd2f   : > { %v1374_v18 = vsub.f32 %v2493_v2, %v1358_v8  ;;  %v1359_v1 = vmul.f32 0.1, %v1316_v20 }
 0xd30   : > { %1449 = vst [vmem:[%s2565_s25 + $0x50] sm:$0xff] %v1376_v59  ;;  %v1377_v24 = vsub.f32 %v2500_v46, %v1361_v56 }
 0xd31   : > { %1447 = vst [vmem:[%s2565_s25 + $0x40] sm:$0xff] %v1374_v18  ;;  %v1375_v42 = vsub.f32 %v2496_v35, %v1359_v1  ;;  %1894 = vmatpush3.bf16.msra.mxu1 %v1387_v19 }
 0xd32   : > { %v1389_v51 = vpack.c.bf16 %v1377_v24, %v1376_v59  ;;  %1450 = vst [vmem:[%s2565_s25 + $0x58] sm:$0xff] %v1377_v24  ;;  %1895 = vmatprep.subr.bf16.mxu1 %v1956_v6 }
 0xd33   : > { %v1388_v60 = vpack.c.bf16 %v1375_v42, %v1374_v18  ;;  %1448 = vst [vmem:[%s2565_s25 + $0x48] sm:$0xff] %v1375_v42  ;;  %v1885_v44 = vpop.f32.mrb[36].mxu1 }
 0xd34   : > { %v1364_v11 = vmul.f32 0.1, %v1885_v44  ;;  %v1329_v36 = vpop.f32.mrb[37].mxu1 }
 0xd35   : > { %v1362_v2 = vmul.f32 0.1, %v1329_v36  ;;  %v1886_v23 = vpop.f32.mrb[38].mxu1  ;;  %1896 = vmatpush3.bf16.msra.mxu1 %v1388_v60 }
 0xd36   : > { %v1380_v46 = vsub.f32 %v2523_v47, %v1364_v11  ;;  %v1365_v35 = vmul.f32 0.1, %v1886_v23  ;;  %v1332_v45 = vpop.f32.mrb[39].mxu1  ;;  %1897 = vmatprep.subr.bf16.mxu1 %v1956_v6 }
 0xd37   : > { %v1378_v58 = vsub.f32 %v2511_v25, %v1362_v2  ;;  %v1363_v63 = vmul.f32 0.1, %v1332_v45  ;;  %v444_v25 = vpack.c.bf16 %v2218_v13, %v2218_v13 }
 0xd38   : > { %1453 = vst [vmem:[%s2565_s25 + $0x70] sm:$0xff] %v1380_v46  ;;  %v1381_v49 = vsub.f32 %v2518_v15, %v1365_v35  ;;  %v1396_v15 = vrot.slane %v2548_v3, %v2150_v41 }
 0xd39   : > { %1451 = vst [vmem:[%s2565_s25 + $0x60] sm:$0xff] %v1378_v58  ;;  %v1379_v17 = vsub.f32 %v2514_v4, %v1363_v63  ;;  %1898 = vmatpush3.bf16.msra.mxu1 %v1389_v51 }
 0xd3a   : > { %v1391_v34 = vpack.c.bf16 %v1381_v49, %v1380_v46  ;;  %1454 = vst [vmem:[%s2565_s25 + $0x78] sm:$0xff] %v1381_v49  ;;  %1899 = vmatprep.subr.bf16.mxu1 %v1956_v6 }
 0xd3b   : > { %v1390_v47 = vpack.c.bf16 %v1379_v17, %v1378_v58  ;;  %1452 = vst [vmem:[%s2565_s25 + $0x68] sm:$0xff] %v1379_v17 }
 0xd3d   : > { %1900 = vmatpush3.bf16.msra.mxu1 %v1390_v47 }
 0xd3e   : > { %1901 = vmatprep.subr.bf16.mxu1 %v1956_v6 }
 0xd41   : > { %1902 = vmatpush3.bf16.msra.mxu1 %v1391_v34 }
 0xd44   : > { %1904 = vmatmul.mubr.bf16.vlgmr.msra.gmra.mrb[40].mxu1 %v444_v25 }
 0xe17   : > { %v1432_v4 = vpop.f32.mrb[40].mxu1 }
 0xe18   : > { %v1433_v52 = vadd.f32 %v1432_v4, %v1396_v15  ;;  %v1905_v62 = vpop.f32.mrb[41].mxu1 }
 0xe19   : > { %v1435_v22 = vpop.f32.mrb[42].mxu1 }
 0xe1a   : > { %1438 = vst [vmem:[%s344_s9] sm:$0xff] %v1433_v52  ;;  %v1906_v26 = vpop.f32.mrb[43].mxu1 }
 0xe1b PF: > { %s19_s27 = sadd.s32 1, %s1952_s27  }
 0xe1c   : > { %p16_p4 = scmp.ge.s32.totalorder %s19_s27, 4  }
 0xe1e   :  { %18 = sbr.rel (!%p16_p4) target bundleno = 1 (0x1), region = 101 }

</bundles_post_ra>
